<compile_context>
chip_gen: v7x
topology: tpu7x:2x2x1
jax: 0.10.0
libtpu: 0.0.40
codegen_flags: <defaults>
</compile_context>

<pallas_src>
import functools

import jax
import jax.numpy as jnp
from jax.experimental import pallas as pl
from jax.experimental.pallas import tpu as pltpu


def _round_up(x, m):
    return (x + m - 1) // m * m


def _plan_dn(D, N, tn, tk):
    """Clamp N/K tiles to the padded problem size (lane-dense multiples of 128)."""
    tn = min(tn, _round_up(N, 128))
    tk = min(tk, _round_up(D, 128))
    return tn, tk, _round_up(D, tk), _round_up(N, tn)


def _plan_batch(B, tb):
    """Sublane-dense batch tile; keep >=2 batch blocks when possible (megacore)."""
    bp16 = _round_up(B, 16)
    tb = min(tb, bp16)
    if bp16 <= tb and B > 16:          # whole batch would fit one tile -> split in 2
        tb = max(16, _round_up(-(-B // 2), 16))
    return tb, _round_up(B, tb)


# ---------------------------------------------------------------------------
# Kernels
# ---------------------------------------------------------------------------
def _masked_cond_kernel_fast(x_ref, w_ref, b_ref, o_ref):
    # Single K block: out = x @ W + bias. No accumulator, no predicates.
    o_ref[...] = jnp.dot(x_ref[...].astype(w_ref.dtype), w_ref[...],
                         preferred_element_type=jnp.float32) + b_ref[...]


def _masked_cond_kernel_acc(x_ref, w_ref, b_ref, o_ref):
    # K-tiled path: accumulate directly into the resident f32 output tile.
    k = pl.program_id(2)

    @pl.when(k == 0)
    def _():
        o_ref[...] = jnp.broadcast_to(b_ref[...], o_ref.shape)

    o_ref[...] += jnp.dot(x_ref[...].astype(w_ref.dtype), w_ref[...],
                          preferred_element_type=jnp.float32)


# ---------------------------------------------------------------------------
# One-time parameter preparation (mask fusion + padding + bf16 cast)
# ---------------------------------------------------------------------------
def prepare_masked_cond_params(w_expr, b_expr, w_cond=None, w_ext=None,
                               w_ext_m=None, mask=None, ext_mask=None, *,
                               tn=256, tk=512, compute_dtype=jnp.bfloat16):
    """Fuse the sub-layer weights into one padded (Dp, Np) slab.

    All weights are nn.Linear-shaped (n_out, n_in_part); masks are the
    (n_in_part, n_out) tensors passed to MaskedLinear.__init__.
    Column order in x must be [expr | ext_m | ext | cond].
    Returns (w_padded bf16, bias_padded f32 (1, Np), n_out).
    """
    n_out = w_expr.shape[0]
    blocks = [(w_expr * mask.T).T if mask is not None else w_expr.T]
    if w_ext_m is not None:
        blocks.append((w_ext_m * ext_mask.T).T if ext_mask is not None
                      else w_ext_m.T)
    if w_ext is not None:
        blocks.append(w_ext.T)
    if w_cond is not None:
        blocks.append(w_cond.T)
    w = jnp.concatenate(blocks, axis=0)            # (D_total, n_out), f32
    D, N = w.shape

    tn, tk, Dp, Np = _plan_dn(D, N, tn, tk)
    # NOTE precision contract: static weights are stored bf16 for the MXU; x is
    # cast to bf16 per-tile inside the kernel; accumulation is f32.
    wp = jnp.zeros((Dp, Np), compute_dtype).at[:D, :N].set(w.astype(compute_dtype))
    b = b_expr if b_expr is not None else jnp.zeros((N,), jnp.float32)
    bp = jnp.zeros((1, Np), jnp.float32).at[0, :N].set(b.astype(jnp.float32))
    return wp, bp, n_out


# ---------------------------------------------------------------------------
# Forward
# ---------------------------------------------------------------------------
@functools.partial(jax.jit, static_argnames=("n_out", "tb", "tn", "tk"))
def masked_cond_layers_forward(x, w_padded, bias_padded, *, n_out,
                               tb=1024, tn=256, tk=512):
    """out = x @ W_masked + bias  (== MaskedCondLayers.forward).

    x: (B, D_total) float; w_padded/bias_padded from prepare_masked_cond_params
    (same tn/tk must be used here).
    """
    B, D = x.shape
    tn, tk, Dp, Np = _plan_dn(D, n_out, tn, tk)
    assert w_padded.shape == (Dp, Np), "w_padded does not match tile plan"
    assert bias_padded.shape == (1, Np), "bias_padded does not match tile plan"
    tb, Bp = _plan_batch(B, tb)

    # Pad x only when needed; zero K-padding is required for correctness.
    xp = x if (Bp, Dp) == (B, D) else jnp.zeros((Bp, Dp), x.dtype).at[:B, :D].set(x)

    k_blocks = Dp // tk
    if k_blocks == 1:
        kernel = _masked_cond_kernel_fast
        grid = (Bp // tb, Np // tn)
        in_specs = [
            pl.BlockSpec((tb, tk), lambda i, j: (i, 0)),    # x tile (f32)
            pl.BlockSpec((tk, tn), lambda i, j: (0, j)),    # W tile (bf16)
            pl.BlockSpec((1, tn), lambda i, j: (0, j)),     # bias row (f32)
        ]
        out_specs = pl.BlockSpec((tb, tn), lambda i, j: (i, j))
        dim_sem = ("parallel", "parallel")
    else:
        kernel = _masked_cond_kernel_acc
        grid = (Bp // tb, Np // tn, k_blocks)
        in_specs = [
            pl.BlockSpec((tb, tk), lambda i, j, k: (i, k)),
            pl.BlockSpec((tk, tn), lambda i, j, k: (k, j)),
            pl.BlockSpec((1, tn), lambda i, j, k: (0, j)),
        ]
        out_specs = pl.BlockSpec((tb, tn), lambda i, j, k: (i, j))
        dim_sem = ("parallel", "parallel", "arbitrary")

    out = pl.pallas_call(
        kernel,
        out_shape=jax.ShapeDtypeStruct((Bp, Np), jnp.float32),
        grid_spec=pltpu.PrefetchScalarGridSpec(
            num_scalar_prefetch=0,
            grid=grid,
            in_specs=in_specs,
            out_specs=out_specs,
        ),
        compiler_params=pltpu.CompilerParams(dimension_semantics=dim_sem),
    )(xp, w_padded, bias_padded)

    if (Bp, Np) != (B, n_out):
        out = out[:B, :n_out]
    return out


if __name__ == "__main__":
    # Small shapes consistent with the module (expimap-style).
    B = 24
    n_in, n_ext_m, n_ext, n_cond, n_out = 200, 8, 8, 4, 144
    D_total = n_in + n_ext_m + n_ext + n_cond

    key = jax.random.PRNGKey(0)
    ks = jax.random.split(key, 8)

    # nn.Linear-shaped parameters: weight is (n_out, n_in_part)
    w_expr = 0.1 * jax.random.normal(ks[0], (n_out, n_in), jnp.float32)      # expr_L.weight
    b_expr = 0.1 * jax.random.normal(ks[1], (n_out,), jnp.float32)           # expr_L.bias
    w_cond = 0.1 * jax.random.normal(ks[2], (n_out, n_cond), jnp.float32)    # cond_L.weight
    w_ext = 0.1 * jax.random.normal(ks[3], (n_out, n_ext), jnp.float32)      # ext_L.weight
    w_ext_m = 0.1 * jax.random.normal(ks[4], (n_out, n_ext_m), jnp.float32)  # ext_L_m.weight

    # masks as passed to MaskedLinear.__init__: shape (n_in_part, n_out)
    mask_expr = (jax.random.uniform(ks[5], (n_in, n_out)) > 0.5).astype(jnp.float32)
    ext_mask = (jax.random.uniform(ks[6], (n_ext_m, n_out)) > 0.5).astype(jnp.float32)

    x = jax.random.normal(ks[7], (B, D_total), jnp.float32)

    # Fused slab for reference checks.
    w_masked = jnp.concatenate(
        [(w_expr * mask_expr.T).T, (w_ext_m * ext_mask.T).T, w_ext.T, w_cond.T],
        axis=0)  # (D_total, n_out)

    # --- fast path (K fits one tile: the common expimap case) --------------
    wp, bp, nout = prepare_masked_cond_params(
        w_expr, b_expr, w_cond=w_cond, w_ext=w_ext, w_ext_m=w_ext_m,
        mask=mask_expr, ext_mask=ext_mask)
    out = masked_cond_layers_forward(x, wp, bp, n_out=nout)
    out = jax.block_until_ready(out)
    assert out.shape == (B, n_out)

    # --- K-accumulation path (small tk forces a 2-step reduction) ----------
    wp2, bp2, _ = prepare_masked_cond_params(
        w_expr, b_expr, w_cond=w_cond, w_ext=w_ext, w_ext_m=w_ext_m,
        mask=mask_expr, ext_mask=ext_mask, tn=128, tk=128)
    out2 = masked_cond_layers_forward(x, wp2, bp2, n_out=nout, tb=16, tn=128, tk=128)
    out2 = jax.block_until_ready(out2)
    assert out2.shape == (B, n_out)

    # --- precision-matched reference (bf16 operands, f32 accumulate) -------
    ref_match = jnp.dot(x.astype(jnp.bfloat16), w_masked.astype(jnp.bfloat16),
                        preferred_element_type=jnp.float32) + b_expr
    assert jnp.allclose(out, ref_match, atol=1e-3, rtol=1e-3), \
        "fast path mismatch vs precision-matched reference"
    assert jnp.allclose(out2, ref_match, atol=1e-3, rtol=1e-3), \
        "acc path mismatch vs precision-matched reference"

    # --- pure-f32 reference mirroring the PyTorch forward exactly ----------
    expr = x[:, :n_in]
    ext_m = x[:, n_in:n_in + n_ext_m]
    ext = x[:, n_in + n_ext_m:n_in + n_ext_m + n_ext]
    cond = x[:, n_in + n_ext_m + n_ext:]
    ref = expr @ (w_expr * mask_expr.T).T + b_expr
    ref = ref + ext @ w_ext.T
    ref = ref + ext_m @ (w_ext_m * ext_mask.T).T
    ref = ref + cond @ w_cond.T
    assert jnp.allclose(out, ref, atol=5e-2, rtol=5e-2), "mismatch vs f32 reference"
    assert jnp.allclose(out2, ref, atol=5e-2, rtol=5e-2), "mismatch vs f32 reference"

    print("KERNEL_OK")
</pallas_src>

<mosaic_0001>
module attributes {stable_mosaic.version = 11 : i64} {
  func.func @_masked_cond_kernel_fast(%arg0: i32, %arg1: i32, %arg2: memref<16x256xf32, #tpu.memory_space<vmem>>, %arg3: memref<256x256xbf16, #tpu.memory_space<vmem>>, %arg4: memref<1x256xf32, #tpu.memory_space<vmem>>, %arg5: memref<16x256xf32, #tpu.memory_space<vmem>>) attributes {dimension_semantics = [#tpu.dimension_semantics<parallel>, #tpu.dimension_semantics<parallel>], iteration_bounds = array<i64: 2, 1>, scalar_prefetch = 0 : i64, scratch_operands = 0 : i64, tpu.core_type = #tpu.core_type<tc>, window_params = [{transform_indices = @transform_0, window_bounds = array<i64: 16, 256>}, {transform_indices = @transform_1, window_bounds = array<i64: 256, 256>}, {transform_indices = @transform_2, window_bounds = array<i64: 1, 256>}, {transform_indices = @transform_3, window_bounds = array<i64: 16, 256>}]} {
    %c0 = arith.constant 0 : index
    %c0_0 = arith.constant 0 : index
    %0 = vector.load %arg2[%c0, %c0_0] : memref<16x256xf32, #tpu.memory_space<vmem>>, vector<16x256xf32>
    %1 = arith.truncf %0 : vector<16x256xf32> to vector<16x256xbf16>
    %c0_1 = arith.constant 0 : index
    %c0_2 = arith.constant 0 : index
    %2 = vector.load %arg3[%c0_1, %c0_2] : memref<256x256xbf16, #tpu.memory_space<vmem>>, vector<256x256xbf16>
    %cst = arith.constant dense<0.000000e+00> : vector<16x256xf32>
    %3 = tpu.matmul %1, %2, %cst {dimension_numbers = #tpu.dot_dimension_numbers<[1], [0], [0], [1], [0, 0, 1, 1], [], []>} : vector<16x256xbf16>, vector<256x256xbf16>, vector<16x256xf32> -> vector<16x256xf32>
    %c0_3 = arith.constant 0 : index
    %c0_4 = arith.constant 0 : index
    %4 = vector.load %arg4[%c0_3, %c0_4] : memref<1x256xf32, #tpu.memory_space<vmem>>, vector<1x256xf32>
    %5 = vector.broadcast %4 : vector<1x256xf32> to vector<16x256xf32>
    %6 = arith.addf %3, %5 : vector<16x256xf32>
    %c0_5 = arith.constant 0 : index
    %c0_6 = arith.constant 0 : index
    %7 = vector.load %arg5[%c0_5, %c0_6] : memref<16x256xf32, #tpu.memory_space<vmem>>, vector<16x256xf32>
    tpu.vector_store %arg5[%c0_5, %c0_6], %6 {strides = array<i32>} : memref<16x256xf32, #tpu.memory_space<vmem>>, vector<16x256xf32>,
    return
  }
  func.func @transform_0(%arg0: i32, %arg1: i32) -> (i32, i32) {
    %c0_i32 = arith.constant 0 : i32
    %c0_i32_0 = arith.constant 0 : i32
    return %arg0, %c0_i32 : i32, i32
  }
  func.func @transform_1(%arg0: i32, %arg1: i32) -> (i32, i32) {
    %c0_i32 = arith.constant 0 : i32
    %c0_i32_0 = arith.constant 0 : i32
    return %c0_i32, %arg1 : i32, i32
  }
  func.func @transform_2(%arg0: i32, %arg1: i32) -> (i32, i32) {
    %c0_i32 = arith.constant 0 : i32
    %c0_i32_0 = arith.constant 0 : i32
    return %c0_i32, %arg1 : i32, i32
  }
  func.func @transform_3(%arg0: i32, %arg1: i32) -> (i32, i32) {
    %c0_i32 = arith.constant 0 : i32
    return %arg0, %arg1 : i32, i32
  }
}

</mosaic_0001>

<bundles_post_ra>
// kernel: masked_cond_layers_forward.1
= control target key start
LH: loop header
LB: loop body
LE: loop exit
PB: predicated region body
PF: predicated region fallthrough
CT: control target
= control target key end

     0   :  { %8 = vsyncpa [#allocation3], 0  ;;  %s826_s12 = smov 0   ;;  %s828_s13 = smov 0   ;;  %s917_s0 = inlined_call_operand.vmem [shape: f32[32,256], index: 0, kind: input, shape index: {}]   ;;  %s918_s1 = inlined_call_operand.hbm [shape: bf16[256,256], index: 1, kind: input, shape index: {}]   ;;  %s919_s2 = inlined_call_operand.vmem [shape: f32[1,256], index: 2, kind: input, shape index: {}]   ;;  %s920_s3 = inlined_call_operand.vmem [shape: f32[32,256], index: 3, kind: output, shape index: {}]  }
   0x1   :  { %s830_s14 = smov 0  }
   0x2 LB: > { %s612_s15 = sadd.s32 4294967295, %s801_s14   ;;  %s26_s16 = sadd.s32 1, %s797_s13  ;;  %s801_s14 = sphi %s830_s14, %s14_s14   ;;  %s797_s13 = sphi %s828_s13, %s930_s13   ;;  %s793_s12 = sphi %s826_s12, %s929_s12  }
   0x3   : > { %p28_p0 = scmp.ge.s32.totalorder %s26_s16, 2  ;;  %p614_p1 = scmp.ge.s32.totalorder %s801_s14, 1 }
   0x4   : > { %p137_p2 = scmp.lt.s32.totalorder %s801_s14, 3  ;;  %p851_p4 = scmp.eq.s32.totalorder %s612_s15, 0 }
   0x5   : > { %s932_s16 = smov (%p28_p0, %s26_s16), 0  ;;  %s803_s19 = smov [#allocation2]  }
   0x6   : > { %p847_p3 = pnand %p614_p1, %p137_p2  ;;  %s152_s20 = sshll.u32 %s803_s19, 4  ;;  %s153_s20 = int_to_ptr.vmem [resolvable:$true] %s152_s20 }
   0x7   : > { %s925_s18 = scalar_select %p851_p4, 1, 0 }
   0x8   : > { %s924_s17 = scalar_select %p847_p3, 1, 0 }
   0x9   : > { %p666_p5 = pneg %p847_p3  ;;  %s747_s24 = scalar_lea.hbm %s918_s1, 4096 }
   0xa   : > { %p748_p7 = scmp.ne.s32.totalorder %s918_s1, %s747_s24  ;;  %p754_p11 = scmp.lt.u32.totalorder %s747_s24, %s918_s1 }
   0xb   : > { %p859_p6 = pnand %p851_p4, %p666_p5 }
   0xd   : > { %p749_p8 = pneg %p859_p6 }
   0xf   : > { %p750_p9 = pnand %p749_p8, %p748_p7 }
  0x11   : > { %p751_p10 = pneg %p750_p9 }
  0x13   : > { %p756_p12 = pnand %p754_p11, %p751_p10 }
  0x15   : > { %759 = shalt.err (!%p756_p12)
}
  0x16   : > { %s760_s29 = scalar_lea.vmem %s153_s20, 4096  ;;  %p768_p2 = scmp.lt.s32.totalorder %s153_s20, %s153_s20 }
  0x17   : > { %p761_p13 = scmp.ne.s32.totalorder %s153_s20, %s760_s29  ;;  %p769_p5 = scmp.lt.s32.totalorder %s760_s29, %s760_s29 }
  0x19   : > { %p763_p0 = pnand %p761_p13, %p749_p8  ;;  %p770_p4 = por %p769_p5, %p768_p2 }
  0x1b   : > { %p764_p1 = pneg %p763_p0 }
  0x1d   : > { %p771_p3 = pnand %p770_p4, %p764_p1 }
  0x1f   : > { %774 = shalt.err (!%p771_p3)
}
  0x20   : > { %s804_s30 = smov 128   ;;  %s805_s4 = smov 8  }
  0x21   : > { %669 = dma.hbm_to_vmem [thread:$0]  (!%p859_p6), %s918_s1, 4096, %s153_s20, [#allocation3], %s804_s30, %s804_s30, %s805_s4  }
  0x22   : > { %p927_p7 = scmp.ne.s32.totalorder %s924_s17, 0 }
  0x23   : > { %p928_p9 = scmp.ne.s32.totalorder (!%p927_p7), %s925_s18, 0 }
  0x24   : > { %186 = sbr.rel (%p927_p7) target bundleno = 327 (0x147), region = 32 }
  0x2b   : > { %788 = dma.done.wait (%p928_p9), [#allocation3], 4096  }
  0x2c   : > { %790 = vsyncadd (%p928_p9), [#allocation3], 4294963200  ;;  %v699_v0 = vld [vmem:[#allocation2 + $0x4] ss:$8 sps:$4 sm:$0xff]   ;;  %v701_v1 = vld [vmem:[#allocation2] ss:$8 sps:$4 sm:$0xff]   ;;  %v285_v38 = vlaneseq }
  0x2d   : > { %455 = vmatprep.subr.bf16.mxu0 %v699_v0  ;;  %v702_v2 = vld [vmem:[#allocation2 + $0x14] ss:$8 sps:$4 sm:$0xff]   ;;  %v704_v3 = vld [vmem:[#allocation2 + $0x10] ss:$8 sps:$4 sm:$0xff]   ;;  %v705_v4 = vld [vmem:[#allocation2 + $0x24] ss:$8 sps:$4 sm:$0xff]  }
  0x2e   : > { %456 = vmatpush1.bf16.msra.mxu0 %v701_v1  ;;  %s620_s7 = sshll.u32 %s793_s12, 1  ;;  %v707_v5 = vld [vmem:[#allocation2 + $0x20] ss:$8 sps:$4 sm:$0xff]   ;;  %v708_v6 = vld [vmem:[#allocation2 + $0x34] ss:$8 sps:$4 sm:$0xff]   ;;  %v286_v39 = vshrl.u32 %v285_v38, 7 }
  0x2f   : > { %457 = vmatprep.subr.bf16.mxu0 %v702_v2  ;;  %p221_p3 = scmp.lt.s32.totalorder %s620_s7, 3  ;;  %v710_v7 = vld [vmem:[#allocation2 + $0x30] ss:$8 sps:$4 sm:$0xff]   ;;  %v711_v8 = vld [vmem:[#allocation2 + $0x44] ss:$8 sps:$4 sm:$0xff]  }
  0x30   : > { %v713_v9 = vld [vmem:[#allocation2 + $0x40] ss:$8 sps:$4 sm:$0xff]   ;;  %v714_v10 = vld [vmem:[#allocation2 + $0x54] ss:$8 sps:$4 sm:$0xff]   ;;  %v716_v11 = vld [vmem:[#allocation2 + $0x50] ss:$8 sps:$4 sm:$0xff]  }
  0x31   : > { %s934_s7 = smov (!%p221_p3, %s620_s7), 3  ;;  %v717_v12 = vld [vmem:[#allocation2 + $0x64] ss:$8 sps:$4 sm:$0xff]   ;;  %v719_v16 = vld [vmem:[#allocation2 + $0x60] ss:$8 sps:$4 sm:$0xff]   ;;  %v287_v40 = vsub.s32 0, %v286_v39 }
  0x32   : > { %458 = vmatpush1.bf16.msra.mxu0 %v704_v3  ;;  %s660_s8 = sshll.u32 %s934_s7, 4  ;;  %v720_v17 = vld [vmem:[#allocation2 + $0x74] ss:$8 sps:$4 sm:$0xff]   ;;  %v722_v18 = vld [vmem:[#allocation2 + $0x70] ss:$8 sps:$4 sm:$0xff]   ;;  %v291_v42 = vsub.s32 1, %v286_v39 }
  0x33   : > { %459 = vmatprep.subr.bf16.mxu0 %v705_v4  ;;  %s894_s11 = scalar_lea.vmem %s917_s0, %s660_s8  ;;  %v723_v19 = vld [vmem:[#allocation2 + $0x84] ss:$8 sps:$4 sm:$0xff]   ;;  %v725_v20 = vld [vmem:[#allocation2 + $0x80] ss:$8 sps:$4 sm:$0xff]   ;;  %v726_v21 = vld [vmem:[#allocation2 + $0x94] ss:$8 sps:$4 sm:$0xff]   ;;  %s242_s19 = scalar_lea.vmem %s920_s3, %s660_s8 }
  0x34   : > { %v246_v13 = vld [vmem:[%s894_s11 + $0x8] sm:$0xff]  ;;  %v248_v14 = vld [vmem:[%s894_s11 + $0x18] sm:$0xff]  ;;  %v245_v35 = vld [vmem:[%s894_s11] sm:$0xff] }
  0x35   : > { %v250_v15 = vpack.c.bf16 %v248_v14, %v246_v13  ;;  %v728_v22 = vld [vmem:[#allocation2 + $0x90] ss:$8 sps:$4 sm:$0xff]   ;;  %v729_v23 = vld [vmem:[#allocation2 + $0xa4] ss:$8 sps:$4 sm:$0xff]   ;;  %v731_v24 = vld [vmem:[#allocation2 + $0xa0] ss:$8 sps:$4 sm:$0xff]  }
  0x36   : > { %460 = vmatpush1.bf16.msra.mxu0 %v707_v5  ;;  %v732_v25 = vld [vmem:[#allocation2 + $0xb4] ss:$8 sps:$4 sm:$0xff]   ;;  %v734_v26 = vld [vmem:[#allocation2 + $0xb0] ss:$8 sps:$4 sm:$0xff]   ;;  %v735_v27 = vld [vmem:[#allocation2 + $0xc4] ss:$8 sps:$4 sm:$0xff]  }
  0x37   : > { %461 = vmatprep.subr.bf16.mxu0 %v708_v6  ;;  %487 = vmatprep.mubr.bf16.mxu0 %v250_v15  ;;  %v737_v28 = vld [vmem:[#allocation2 + $0xc0] ss:$8 sps:$4 sm:$0xff]   ;;  %v738_v29 = vld [vmem:[#allocation2 + $0xd4] ss:$8 sps:$4 sm:$0xff]   ;;  %v740_v30 = vld [vmem:[#allocation2 + $0xd0] ss:$8 sps:$4 sm:$0xff]  }
  0x38   : > { %v741_v31 = vld [vmem:[#allocation2 + $0xe4] ss:$8 sps:$4 sm:$0xff]   ;;  %v743_v32 = vld [vmem:[#allocation2 + $0xe0] ss:$8 sps:$4 sm:$0xff]   ;;  %v744_v33 = vld [vmem:[#allocation2 + $0xf4] ss:$8 sps:$4 sm:$0xff]  }
  0x39   : > { %v746_v34 = vld [vmem:[#allocation2 + $0xf0] ss:$8 sps:$4 sm:$0xff]   ;;  %v283_v41 = vld [vmem:[%s919_s2] sm:$0x3] }
  0x3a   : > { %462 = vmatpush1.bf16.msra.mxu0 %v710_v7  ;;  %v247_v36 = vld [vmem:[%s894_s11 + $0x10] sm:$0xff]  ;;  %v288_v43 = vrot.slane %v283_v41, %v287_v40  ;;  %v292_v44 = vrot.slane %v283_v41, %v291_v42 }
  0x3b   : > { %463 = vmatprep.subr.bf16.mxu0 %v711_v8  ;;  %v249_v37 = vpack.c.bf16 %v247_v36, %v245_v35 }
  0x3e   : > { %464 = vmatpush1.bf16.msra.mxu0 %v713_v9 }
  0x3f   : > { %465 = vmatprep.subr.bf16.mxu0 %v714_v10 }
  0x42   : > { %466 = vmatpush1.bf16.msra.mxu0 %v716_v11 }
  0x43   : > { %467 = vmatprep.subr.bf16.mxu0 %v717_v12 }
  0x46   : > { %468 = vmatpush1.bf16.msra.mxu0 %v719_v16 }
  0x47   : > { %469 = vmatprep.subr.bf16.mxu0 %v720_v17 }
  0x4a   : > { %470 = vmatpush1.bf16.msra.mxu0 %v722_v18 }
  0x4b   : > { %471 = vmatprep.subr.bf16.mxu0 %v723_v19 }
  0x4e   : > { %472 = vmatpush1.bf16.msra.mxu0 %v725_v20 }
  0x4f   : > { %473 = vmatprep.subr.bf16.mxu0 %v726_v21 }
  0x52   : > { %474 = vmatpush1.bf16.msra.mxu0 %v728_v22 }
  0x53   : > { %475 = vmatprep.subr.bf16.mxu0 %v729_v23 }
  0x56   : > { %476 = vmatpush1.bf16.msra.mxu0 %v731_v24 }
  0x57   : > { %477 = vmatprep.subr.bf16.mxu0 %v732_v25 }
  0x5a   : > { %478 = vmatpush1.bf16.msra.mxu0 %v734_v26 }
  0x5b   : > { %479 = vmatprep.subr.bf16.mxu0 %v735_v27 }
  0x5e   : > { %480 = vmatpush1.bf16.msra.mxu0 %v737_v28 }
  0x5f   : > { %481 = vmatprep.subr.bf16.mxu0 %v738_v29 }
  0x62   : > { %482 = vmatpush1.bf16.msra.mxu0 %v740_v30 }
  0x63   : > { %483 = vmatprep.subr.bf16.mxu0 %v741_v31 }
  0x66   : > { %484 = vmatpush1.bf16.msra.mxu0 %v743_v32 }
  0x67   : > { %485 = vmatprep.subr.bf16.mxu0 %v744_v33 }
  0x6a   : > { %486 = vmatpush1.bf16.msra.mxu0 %v746_v34 }
  0x6d   : > { %488 = vmatmul.mubr.bf16.vlgmr.msra.gmra.mrb[0].mxu0 %v249_v37 }
 0x140   : > { %v489_v45 = vpop.f32.mrb[0].mxu0 }
 0x141   : > { %v490_v46 = vadd.f32 %v489_v45, %v288_v43  ;;  %v491_v47 = vpop.f32.mrb[1].mxu0 }
 0x142   : > { %v492_v48 = vadd.f32 %v491_v47, %v292_v44  ;;  %v493_v49 = vpop.f32.mrb[2].mxu0 }
 0x143   : > { %498 = vst [vmem:[%s242_s19] sm:$0xff] %v490_v46  ;;  %v494_v50 = vadd.f32 %v493_v49, %v288_v43  ;;  %v495_v51 = vpop.f32.mrb[3].mxu0 }
 0x144   : > { %499 = vst [vmem:[%s242_s19 + $0x8] sm:$0xff] %v492_v48  ;;  %v496_v52 = vadd.f32 %v495_v51, %v292_v44 }
 0x145   : > { %500 = vst [vmem:[%s242_s19 + $0x10] sm:$0xff] %v494_v50 }
 0x146   : > { %501 = vst [vmem:[%s242_s19 + $0x18] sm:$0xff] %v496_v52 }
 0x147 PF: > { %s14_s14 = sadd.s32 1, %s801_s14   ;;  %s929_s12 = smov %s797_s13 }
 0x148   : > { %p11_p4 = scmp.ge.s32.totalorder %s14_s14, 4   ;;  %s930_s13 = smov %s932_s16 }
 0x14a   :  { %13 = sbr.rel (!%p11_p4) target bundleno = 2 (0x2), region = 71 }
 0x151   :  { %535 = vsyncpa [#allocation3], 1 }
 0x152   :  { %537 = vsyncpa [#allocation3 + $0x1], 1 }

</bundles_post_ra>
